<compile_context>
chip_gen: v5e
topology: v5e:2x2
jax: 0.10.0
libtpu: 0.0.40
codegen_flags: <defaults>
</compile_context>

<pallas_src>
import functools

import jax
import jax.numpy as jnp
import numpy as np
from jax.experimental import pallas as pl
from jax.experimental.pallas import tpu as pltpu


def _residual_block_kernel(x_ref, w1_ref, b1_ref, w2_ref, b2_ref, out_ref,
                           xpad_ref, slab_ref, *, H, W, C, k_pad):
    # x_ref:    (1, C, H*W)            one image, spatial dim flat on lanes
    # w1_ref:   (k_pad, 9*k_pad)       packed conv1 weights (rows >= C are 0)
    # b1_ref:   (k_pad, 1)
    # w2_ref:   (C, 9*k_pad)           packed conv2 weights
    # b2_ref:   (C, 1)
    # out_ref:  (1, C, H*W)
    # xpad_ref: VMEM (k_pad, H*W + 2*(W+1))  zero-haloed flat activation buffer
    # slab_ref: VMEM (9*k_pad, H*W)          im2col slab (one matmul per conv)
    HW = H * W
    PADC = W + 1                                   # halo width covers dy,dx in {-1,0,1}

    x = x_ref[0]                                   # (C, HW) f32

    # Left/right image-border masks (shared by both convs; vertical borders are
    # handled for free by the zero halo of xpad).
    col = jax.lax.broadcasted_iota(jnp.int32, (1, HW), 1) % W
    col_lo = col >= 1                              # valid for dx == 0 taps
    col_hi = col <= W - 2                          # valid for dx == 2 taps

    def fill_slab():
        """im2col: 9 lane-shifted views of xpad -> (9*k_pad, HW) slab."""
        for t in range(9):
            dy, dx = divmod(t, 3)
            off = (dy - 1) * W + (dx - 1)          # flat spatial shift of this tap
            v = xpad_ref[:, PADC + off: PADC + off + HW]     # (k_pad, HW)
            if dx == 0:
                v = jnp.where(col_lo, v, 0.0)
            elif dx == 2:
                v = jnp.where(col_hi, v, 0.0)
            # tile-aligned full-width store (sublane offset is a multiple of 8)
            slab_ref[t * k_pad:(t + 1) * k_pad, :] = v

    # ---- conv1 + relu1: one (k_pad, 9*k_pad) @ (9*k_pad, HW) MXU matmul ----
    xpad_ref[...] = jnp.zeros_like(xpad_ref)       # zero halo + zero channel pad
    xpad_ref[0:C, PADC:PADC + HW] = x
    fill_slab()
    h = jnp.dot(w1_ref[...], slab_ref[...],
                preferred_element_type=jnp.float32,
                precision=jax.lax.Precision.HIGHEST)
    h = jnp.maximum(h + b1_ref[...], 0.0)          # (k_pad, HW); rows >= C stay 0

    # ---- conv2 + relu2 + residual ----
    xpad_ref[:, PADC:PADC + HW] = h                # halo columns stay zero
    fill_slab()
    o = jnp.dot(w2_ref[...], slab_ref[...],
                preferred_element_type=jnp.float32,
                precision=jax.lax.Precision.HIGHEST)
    out_ref[0] = jnp.maximum(o + b2_ref[...], 0.0) + x


def _pack_conv(w, b, k_pad, out_rows):
    """Pack torch-layout (Cout, Cin, 3, 3) weights into a (out_rows, 9*k_pad)
    slab-matmul weight: column index = tap*k_pad + ci, tap = dy*3 + dx."""
    c_out, c_in, kh, kw = w.shape
    wt = jnp.transpose(w, (2, 3, 1, 0)).reshape(kh * kw, c_in, c_out)   # [t, ci, co]
    wt = jnp.pad(wt, ((0, 0), (0, k_pad - c_in), (0, 0)))               # [t, k_pad, co]
    w_packed = jnp.transpose(wt.reshape(kh * kw * k_pad, c_out), (1, 0))  # (c_out, 9*k_pad)
    b_col = b.reshape(c_out, 1)
    if out_rows > c_out:
        w_packed = jnp.pad(w_packed, ((0, out_rows - c_out), (0, 0)))
        b_col = jnp.pad(b_col, ((0, out_rows - c_out), (0, 0)))
    return w_packed.astype(jnp.float32), b_col.astype(jnp.float32)


def simple_residual_block(x_nchw, w1, b1, w2, b2):
    """x_nchw: (N, C, H, W) f32; w*: (Cout, Cin, 3, 3) torch layout; b*: (C,)."""
    N, C, H, W = x_nchw.shape
    HW = H * W
    k_pad = max(8, ((C + 7) // 8) * 8)             # per-tap sublane-tile padding

    x_flat = x_nchw.reshape(N, C, HW)              # contiguous reshape (free)
    w1p, b1p = _pack_conv(w1, b1, k_pad, k_pad)    # conv1 output padded to k_pad rows
    w2p, b2p = _pack_conv(w2, b2, k_pad, C)        # conv2 output = real C rows

    kernel = functools.partial(_residual_block_kernel, H=H, W=W, C=C, k_pad=k_pad)
    out_flat = pl.pallas_call(
        kernel,
        out_shape=jax.ShapeDtypeStruct((N, C, HW), jnp.float32),
        grid_spec=pltpu.PrefetchScalarGridSpec(
            num_scalar_prefetch=0,
            grid=(N,),
            in_specs=[
                pl.BlockSpec((1, C, HW), lambda n: (n, 0, 0)),
                pl.BlockSpec((k_pad, 9 * k_pad), lambda n: (0, 0)),
                pl.BlockSpec((k_pad, 1), lambda n: (0, 0)),
                pl.BlockSpec((C, 9 * k_pad), lambda n: (0, 0)),
                pl.BlockSpec((C, 1), lambda n: (0, 0)),
            ],
            out_specs=pl.BlockSpec((1, C, HW), lambda n: (n, 0, 0)),
            scratch_shapes=[
                pltpu.VMEM((k_pad, HW + 2 * (W + 1)), jnp.float32),  # zero-haloed flat act
                pltpu.VMEM((9 * k_pad, HW), jnp.float32),            # im2col slab
            ],
        ),
        compiler_params=pltpu.CompilerParams(
            dimension_semantics=("parallel",),      # batch images are independent
            vmem_limit_bytes=32 * 1024 * 1024,
        ),
    )(x_flat, w1p, b1p, w2p, b2p)
    return out_flat.reshape(N, C, H, W)


def _reference(x, w1, b1, w2, b2):
    dn = ('NCHW', 'OIHW', 'NCHW')
    out = jax.lax.conv_general_dilated(x, w1, (1, 1), ((1, 1), (1, 1)),
                                       dimension_numbers=dn,
                                       precision=jax.lax.Precision.HIGHEST)
    out = jnp.maximum(out + b1[None, :, None, None], 0.0)
    out = jax.lax.conv_general_dilated(out, w2, (1, 1), ((1, 1), (1, 1)),
                                       dimension_numbers=dn,
                                       precision=jax.lax.Precision.HIGHEST)
    out = jnp.maximum(out + b2[None, :, None, None], 0.0)
    return out + x


if __name__ == "__main__":
    N, C, H, W = 2, 3, 16, 16
    key = jax.random.PRNGKey(0)
    kx, kw1, kb1, kw2, kb2 = jax.random.split(key, 5)

    bound = 1.0 / np.sqrt(C * 3 * 3)
    x = jax.random.normal(kx, (N, C, H, W), jnp.float32)
    w1 = jax.random.uniform(kw1, (C, C, 3, 3), jnp.float32, -bound, bound)
    b1 = jax.random.uniform(kb1, (C,), jnp.float32, -bound, bound)
    w2 = jax.random.uniform(kw2, (C, C, 3, 3), jnp.float32, -bound, bound)
    b2 = jax.random.uniform(kb2, (C,), jnp.float32, -bound, bound)

    out = simple_residual_block(x, w1, b1, w2, b2)
    out = jax.block_until_ready(out)

    ref = jax.block_until_ready(_reference(x, w1, b1, w2, b2))
    np.testing.assert_allclose(np.asarray(out), np.asarray(ref), atol=1e-4, rtol=1e-4)

    print("KERNEL_OK")
</pallas_src>

<mosaic_0001>
module attributes {stable_mosaic.version = 11 : i64} {
  func.func @_residual_block_kernel(%arg0: i32, %arg1: memref<1x3x256xf32, #tpu.memory_space<vmem>>, %arg2: memref<8x72xf32, #tpu.memory_space<vmem>>, %arg3: memref<8x1xf32, #tpu.memory_space<vmem>>, %arg4: memref<3x72xf32, #tpu.memory_space<vmem>>, %arg5: memref<3x1xf32, #tpu.memory_space<vmem>>, %arg6: memref<1x3x256xf32, #tpu.memory_space<vmem>>, %arg7: memref<8x290xf32, #tpu.memory_space<vmem>>, %arg8: memref<72x256xf32, #tpu.memory_space<vmem>>) attributes {dimension_semantics = [#tpu.dimension_semantics<parallel>], iteration_bounds = array<i64: 2>, scalar_prefetch = 0 : i64, scratch_operands = 2 : i64, tpu.core_type = #tpu.core_type<tc>, window_params = [{transform_indices = @transform_0, window_bounds = array<i64: 1, 3, 256>}, {pipeline_mode = #tpu.pipeline_mode<synchronous>, transform_indices = @transform_1, window_bounds = array<i64: 8, 72>}, {pipeline_mode = #tpu.pipeline_mode<synchronous>, transform_indices = @transform_2, window_bounds = array<i64: 8, 1>}, {pipeline_mode = #tpu.pipeline_mode<synchronous>, transform_indices = @transform_3, window_bounds = array<i64: 3, 72>}, {pipeline_mode = #tpu.pipeline_mode<synchronous>, transform_indices = @transform_4, window_bounds = array<i64: 3, 1>}, {transform_indices = @transform_5, window_bounds = array<i64: 1, 3, 256>}]} {
    %c0 = arith.constant 0 : index
    %c0_0 = arith.constant 0 : index
    %c0_1 = arith.constant 0 : index
    %0 = vector.load %arg1[%c0, %c0_0, %c0_1] : memref<1x3x256xf32, #tpu.memory_space<vmem>>, vector<1x3x256xf32>
    %1 = vector.shape_cast %0 : vector<1x3x256xf32> to vector<3x256xf32>
    %2 = tpu.iota {dimensions = array<i32: 1>} : vector<1x256xi32>
    %c16_i32 = arith.constant 16 : i32
    %c0_i32 = arith.constant 0 : i32
    %3 = arith.cmpi eq, %c16_i32, %c0_i32 : i32
    %c1_i32 = arith.constant 1 : i32
    %4 = arith.select %3, %c1_i32, %c16_i32 : i32
    %5 = vector.broadcast %4 : i32 to vector<1x256xi32>
    %6 = arith.remsi %2, %5 : vector<1x256xi32>
    %c0_i32_2 = arith.constant 0 : i32
    %7 = vector.broadcast %c0_i32_2 : i32 to vector<1x256xi32>
    %8 = arith.cmpi ne, %6, %7 : vector<1x256xi32>
    %c0_i32_3 = arith.constant 0 : i32
    %9 = vector.broadcast %c0_i32_3 : i32 to vector<1x256xi32>
    %10 = arith.cmpi slt, %6, %9 : vector<1x256xi32>
    %c0_i32_4 = arith.constant 0 : i32
    %11 = arith.cmpi slt, %4, %c0_i32_4 : i32
    %12 = vector.broadcast %11 : i1 to vector<1x256xi1>
    %13 = vector.broadcast %12 : vector<1x256xi1> to vector<1x256xi1>
    %14 = arith.xori %10, %13 : vector<1x256xi1>
    %15 = arith.andi %14, %8 : vector<1x256xi1>
    %16 = vector.broadcast %4 : i32 to vector<1x256xi32>
    %17 = arith.addi %6, %16 : vector<1x256xi32>
    %18 = arith.select %15, %17, %6 : vector<1x256xi1>, vector<1x256xi32>
    %c1_i32_5 = arith.constant 1 : i32
    %19 = vector.broadcast %c1_i32_5 : i32 to vector<1x256xi32>
    %20 = arith.cmpi sge, %18, %19 : vector<1x256xi32>
    %c14_i32 = arith.constant 14 : i32
    %21 = vector.broadcast %c14_i32 : i32 to vector<1x256xi32>
    %22 = arith.cmpi sle, %18, %21 : vector<1x256xi32>
    %cst = arith.constant 0.000000e+00 : f32
    %23 = vector.broadcast %cst : f32 to vector<8x290xf32>
    %c0_6 = arith.constant 0 : index
    %c0_7 = arith.constant 0 : index
    %24 = vector.load %arg7[%c0_6, %c0_7] : memref<8x290xf32, #tpu.memory_space<vmem>>, vector<8x290xf32>
    tpu.vector_store %arg7[%c0_6, %c0_7], %23 {strides = array<i32>} : memref<8x290xf32, #tpu.memory_space<vmem>>, vector<8x290xf32>,
    %c0_8 = arith.constant 0 : index
    %c17 = arith.constant 17 : index
    %25 = vector.load %arg7[%c0_8, %c17] : memref<8x290xf32, #tpu.memory_space<vmem>>, vector<3x256xf32>
    tpu.vector_store %arg7[%c0_8, %c17], %1 {strides = array<i32>} : memref<8x290xf32, #tpu.memory_space<vmem>>, vector<3x256xf32>,
    %c0_9 = arith.constant 0 : index
    %c0_10 = arith.constant 0 : index
    %26 = vector.load %arg7[%c0_9, %c0_10] : memref<8x290xf32, #tpu.memory_space<vmem>>, vector<8x256xf32>
    %cst_11 = arith.constant 0.000000e+00 : f32
    %27 = vector.shape_cast %20 : vector<1x256xi1> to vector<1x256xi1>
    %28 = vector.broadcast %27 : vector<1x256xi1> to vector<8x256xi1>
    %29 = vector.broadcast %cst_11 : f32 to vector<8x256xf32>
    %30 = arith.select %28, %26, %29 : vector<8x256xi1>, vector<8x256xf32>
    %c0_12 = arith.constant 0 : index
    %c0_13 = arith.constant 0 : index
    %31 = vector.load %arg8[%c0_12, %c0_13] : memref<72x256xf32, #tpu.memory_space<vmem>>, vector<8x256xf32>
    tpu.vector_store %arg8[%c0_12, %c0_13], %30 {strides = array<i32>} : memref<72x256xf32, #tpu.memory_space<vmem>>, vector<8x256xf32>,
    %c0_14 = arith.constant 0 : index
    %c1 = arith.constant 1 : index
    %32 = vector.load %arg7[%c0_14, %c1] : memref<8x290xf32, #tpu.memory_space<vmem>>, vector<8x256xf32>
    %c8 = arith.constant 8 : index
    %c0_15 = arith.constant 0 : index
    %33 = vector.load %arg8[%c8, %c0_15] : memref<72x256xf32, #tpu.memory_space<vmem>>, vector<8x256xf32>
    tpu.vector_store %arg8[%c8, %c0_15], %32 {strides = array<i32>} : memref<72x256xf32, #tpu.memory_space<vmem>>, vector<8x256xf32>,
    %c0_16 = arith.constant 0 : index
    %c2 = arith.constant 2 : index
    %34 = vector.load %arg7[%c0_16, %c2] : memref<8x290xf32, #tpu.memory_space<vmem>>, vector<8x256xf32>
    %cst_17 = arith.constant 0.000000e+00 : f32
    %35 = vector.shape_cast %22 : vector<1x256xi1> to vector<1x256xi1>
    %36 = vector.broadcast %35 : vector<1x256xi1> to vector<8x256xi1>
    %37 = vector.broadcast %cst_17 : f32 to vector<8x256xf32>
    %38 = arith.select %36, %34, %37 : vector<8x256xi1>, vector<8x256xf32>
    %c16 = arith.constant 16 : index
    %c0_18 = arith.constant 0 : index
    %39 = vector.load %arg8[%c16, %c0_18] : memref<72x256xf32, #tpu.memory_space<vmem>>, vector<8x256xf32>
    tpu.vector_store %arg8[%c16, %c0_18], %38 {strides = array<i32>} : memref<72x256xf32, #tpu.memory_space<vmem>>, vector<8x256xf32>,
    %c0_19 = arith.constant 0 : index
    %c16_20 = arith.constant 16 : index
    %40 = vector.load %arg7[%c0_19, %c16_20] : memref<8x290xf32, #tpu.memory_space<vmem>>, vector<8x256xf32>
    %cst_21 = arith.constant 0.000000e+00 : f32
    %41 = vector.shape_cast %20 : vector<1x256xi1> to vector<1x256xi1>
    %42 = vector.broadcast %41 : vector<1x256xi1> to vector<8x256xi1>
    %43 = vector.broadcast %cst_21 : f32 to vector<8x256xf32>
    %44 = arith.select %42, %40, %43 : vector<8x256xi1>, vector<8x256xf32>
    %c24 = arith.constant 24 : index
    %c0_22 = arith.constant 0 : index
    %45 = vector.load %arg8[%c24, %c0_22] : memref<72x256xf32, #tpu.memory_space<vmem>>, vector<8x256xf32>
    tpu.vector_store %arg8[%c24, %c0_22], %44 {strides = array<i32>} : memref<72x256xf32, #tpu.memory_space<vmem>>, vector<8x256xf32>,
    %c0_23 = arith.constant 0 : index
    %c17_24 = arith.constant 17 : index
    %46 = vector.load %arg7[%c0_23, %c17_24] : memref<8x290xf32, #tpu.memory_space<vmem>>, vector<8x256xf32>
    %c32 = arith.constant 32 : index
    %c0_25 = arith.constant 0 : index
    %47 = vector.load %arg8[%c32, %c0_25] : memref<72x256xf32, #tpu.memory_space<vmem>>, vector<8x256xf32>
    tpu.vector_store %arg8[%c32, %c0_25], %46 {strides = array<i32>} : memref<72x256xf32, #tpu.memory_space<vmem>>, vector<8x256xf32>,
    %c0_26 = arith.constant 0 : index
    %c18 = arith.constant 18 : index
    %48 = vector.load %arg7[%c0_26, %c18] : memref<8x290xf32, #tpu.memory_space<vmem>>, vector<8x256xf32>
    %cst_27 = arith.constant 0.000000e+00 : f32
    %49 = vector.shape_cast %22 : vector<1x256xi1> to vector<1x256xi1>
    %50 = vector.broadcast %49 : vector<1x256xi1> to vector<8x256xi1>
    %51 = vector.broadcast %cst_27 : f32 to vector<8x256xf32>
    %52 = arith.select %50, %48, %51 : vector<8x256xi1>, vector<8x256xf32>
    %c40 = arith.constant 40 : index
    %c0_28 = arith.constant 0 : index
    %53 = vector.load %arg8[%c40, %c0_28] : memref<72x256xf32, #tpu.memory_space<vmem>>, vector<8x256xf32>
    tpu.vector_store %arg8[%c40, %c0_28], %52 {strides = array<i32>} : memref<72x256xf32, #tpu.memory_space<vmem>>, vector<8x256xf32>,
    %c0_29 = arith.constant 0 : index
    %c32_30 = arith.constant 32 : index
    %54 = vector.load %arg7[%c0_29, %c32_30] : memref<8x290xf32, #tpu.memory_space<vmem>>, vector<8x256xf32>
    %cst_31 = arith.constant 0.000000e+00 : f32
    %55 = vector.shape_cast %20 : vector<1x256xi1> to vector<1x256xi1>
    %56 = vector.broadcast %55 : vector<1x256xi1> to vector<8x256xi1>
    %57 = vector.broadcast %cst_31 : f32 to vector<8x256xf32>
    %58 = arith.select %56, %54, %57 : vector<8x256xi1>, vector<8x256xf32>
    %c48 = arith.constant 48 : index
    %c0_32 = arith.constant 0 : index
    %59 = vector.load %arg8[%c48, %c0_32] : memref<72x256xf32, #tpu.memory_space<vmem>>, vector<8x256xf32>
    tpu.vector_store %arg8[%c48, %c0_32], %58 {strides = array<i32>} : memref<72x256xf32, #tpu.memory_space<vmem>>, vector<8x256xf32>,
    %c0_33 = arith.constant 0 : index
    %c33 = arith.constant 33 : index
    %60 = vector.load %arg7[%c0_33, %c33] : memref<8x290xf32, #tpu.memory_space<vmem>>, vector<8x256xf32>
    %c56 = arith.constant 56 : index
    %c0_34 = arith.constant 0 : index
    %61 = vector.load %arg8[%c56, %c0_34] : memref<72x256xf32, #tpu.memory_space<vmem>>, vector<8x256xf32>
    tpu.vector_store %arg8[%c56, %c0_34], %60 {strides = array<i32>} : memref<72x256xf32, #tpu.memory_space<vmem>>, vector<8x256xf32>,
    %c0_35 = arith.constant 0 : index
    %c34 = arith.constant 34 : index
    %62 = vector.load %arg7[%c0_35, %c34] : memref<8x290xf32, #tpu.memory_space<vmem>>, vector<8x256xf32>
    %cst_36 = arith.constant 0.000000e+00 : f32
    %63 = vector.shape_cast %22 : vector<1x256xi1> to vector<1x256xi1>
    %64 = vector.broadcast %63 : vector<1x256xi1> to vector<8x256xi1>
    %65 = vector.broadcast %cst_36 : f32 to vector<8x256xf32>
    %66 = arith.select %64, %62, %65 : vector<8x256xi1>, vector<8x256xf32>
    %c64 = arith.constant 64 : index
    %c0_37 = arith.constant 0 : index
    %67 = vector.load %arg8[%c64, %c0_37] : memref<72x256xf32, #tpu.memory_space<vmem>>, vector<8x256xf32>
    tpu.vector_store %arg8[%c64, %c0_37], %66 {strides = array<i32>} : memref<72x256xf32, #tpu.memory_space<vmem>>, vector<8x256xf32>,
    %c0_38 = arith.constant 0 : index
    %c0_39 = arith.constant 0 : index
    %68 = vector.load %arg2[%c0_38, %c0_39] : memref<8x72xf32, #tpu.memory_space<vmem>>, vector<8x72xf32>
    %c0_40 = arith.constant 0 : index
    %c0_41 = arith.constant 0 : index
    %69 = vector.load %arg8[%c0_40, %c0_41] : memref<72x256xf32, #tpu.memory_space<vmem>>, vector<72x256xf32>
    %cst_42 = arith.constant dense<0.000000e+00> : vector<8x256xf32>
    %70 = tpu.matmul %68, %69, %cst_42 {dimension_numbers = #tpu.dot_dimension_numbers<[1], [0], [0], [1], [0, 0, 1, 1], [], []>, precision = #tpu.contract_precision<fp32>} : vector<8x72xf32>, vector<72x256xf32>, vector<8x256xf32> -> vector<8x256xf32>
    %c0_43 = arith.constant 0 : index
    %c0_44 = arith.constant 0 : index
    %71 = vector.load %arg3[%c0_43, %c0_44] : memref<8x1xf32, #tpu.memory_space<vmem>>, vector<8x1xf32>
    %72 = vector.broadcast %71 : vector<8x1xf32> to vector<8x256xf32>
    %73 = arith.addf %70, %72 : vector<8x256xf32>
    %cst_45 = arith.constant 0.000000e+00 : f32
    %74 = vector.broadcast %cst_45 : f32 to vector<8x256xf32>
    %75 = arith.maximumf %73, %74 : vector<8x256xf32>
    %c0_46 = arith.constant 0 : index
    %c17_47 = arith.constant 17 : index
    %76 = vector.load %arg7[%c0_46, %c17_47] : memref<8x290xf32, #tpu.memory_space<vmem>>, vector<8x256xf32>
    tpu.vector_store %arg7[%c0_46, %c17_47], %75 {strides = array<i32>} : memref<8x290xf32, #tpu.memory_space<vmem>>, vector<8x256xf32>,
    %c0_48 = arith.constant 0 : index
    %c0_49 = arith.constant 0 : index
    %77 = vector.load %arg7[%c0_48, %c0_49] : memref<8x290xf32, #tpu.memory_space<vmem>>, vector<8x256xf32>
    %cst_50 = arith.constant 0.000000e+00 : f32
    %78 = vector.shape_cast %20 : vector<1x256xi1> to vector<1x256xi1>
    %79 = vector.broadcast %78 : vector<1x256xi1> to vector<8x256xi1>
    %80 = vector.broadcast %cst_50 : f32 to vector<8x256xf32>
    %81 = arith.select %79, %77, %80 : vector<8x256xi1>, vector<8x256xf32>
    %c0_51 = arith.constant 0 : index
    %c0_52 = arith.constant 0 : index
    %82 = vector.load %arg8[%c0_51, %c0_52] : memref<72x256xf32, #tpu.memory_space<vmem>>, vector<8x256xf32>
    tpu.vector_store %arg8[%c0_51, %c0_52], %81 {strides = array<i32>} : memref<72x256xf32, #tpu.memory_space<vmem>>, vector<8x256xf32>,
    %c0_53 = arith.constant 0 : index
    %c1_54 = arith.constant 1 : index
    %83 = vector.load %arg7[%c0_53, %c1_54] : memref<8x290xf32, #tpu.memory_space<vmem>>, vector<8x256xf32>
    %c8_55 = arith.constant 8 : index
    %c0_56 = arith.constant 0 : index
    %84 = vector.load %arg8[%c8_55, %c0_56] : memref<72x256xf32, #tpu.memory_space<vmem>>, vector<8x256xf32>
    tpu.vector_store %arg8[%c8_55, %c0_56], %83 {strides = array<i32>} : memref<72x256xf32, #tpu.memory_space<vmem>>, vector<8x256xf32>,
    %c0_57 = arith.constant 0 : index
    %c2_58 = arith.constant 2 : index
    %85 = vector.load %arg7[%c0_57, %c2_58] : memref<8x290xf32, #tpu.memory_space<vmem>>, vector<8x256xf32>
    %cst_59 = arith.constant 0.000000e+00 : f32
    %86 = vector.shape_cast %22 : vector<1x256xi1> to vector<1x256xi1>
    %87 = vector.broadcast %86 : vector<1x256xi1> to vector<8x256xi1>
    %88 = vector.broadcast %cst_59 : f32 to vector<8x256xf32>
    %89 = arith.select %87, %85, %88 : vector<8x256xi1>, vector<8x256xf32>
    %c16_60 = arith.constant 16 : index
    %c0_61 = arith.constant 0 : index
    %90 = vector.load %arg8[%c16_60, %c0_61] : memref<72x256xf32, #tpu.memory_space<vmem>>, vector<8x256xf32>
    tpu.vector_store %arg8[%c16_60, %c0_61], %89 {strides = array<i32>} : memref<72x256xf32, #tpu.memory_space<vmem>>, vector<8x256xf32>,
    %c0_62 = arith.constant 0 : index
    %c16_63 = arith.constant 16 : index
    %91 = vector.load %arg7[%c0_62, %c16_63] : memref<8x290xf32, #tpu.memory_space<vmem>>, vector<8x256xf32>
    %cst_64 = arith.constant 0.000000e+00 : f32
    %92 = vector.shape_cast %20 : vector<1x256xi1> to vector<1x256xi1>
    %93 = vector.broadcast %92 : vector<1x256xi1> to vector<8x256xi1>
    %94 = vector.broadcast %cst_64 : f32 to vector<8x256xf32>
    %95 = arith.select %93, %91, %94 : vector<8x256xi1>, vector<8x256xf32>
    %c24_65 = arith.constant 24 : index
    %c0_66 = arith.constant 0 : index
    %96 = vector.load %arg8[%c24_65, %c0_66] : memref<72x256xf32, #tpu.memory_space<vmem>>, vector<8x256xf32>
    tpu.vector_store %arg8[%c24_65, %c0_66], %95 {strides = array<i32>} : memref<72x256xf32, #tpu.memory_space<vmem>>, vector<8x256xf32>,
    %c0_67 = arith.constant 0 : index
    %c17_68 = arith.constant 17 : index
    %97 = vector.load %arg7[%c0_67, %c17_68] : memref<8x290xf32, #tpu.memory_space<vmem>>, vector<8x256xf32>
    %c32_69 = arith.constant 32 : index
    %c0_70 = arith.constant 0 : index
    %98 = vector.load %arg8[%c32_69, %c0_70] : memref<72x256xf32, #tpu.memory_space<vmem>>, vector<8x256xf32>
    tpu.vector_store %arg8[%c32_69, %c0_70], %97 {strides = array<i32>} : memref<72x256xf32, #tpu.memory_space<vmem>>, vector<8x256xf32>,
    %c0_71 = arith.constant 0 : index
    %c18_72 = arith.constant 18 : index
    %99 = vector.load %arg7[%c0_71, %c18_72] : memref<8x290xf32, #tpu.memory_space<vmem>>, vector<8x256xf32>
    %cst_73 = arith.constant 0.000000e+00 : f32
    %100 = vector.shape_cast %22 : vector<1x256xi1> to vector<1x256xi1>
    %101 = vector.broadcast %100 : vector<1x256xi1> to vector<8x256xi1>
    %102 = vector.broadcast %cst_73 : f32 to vector<8x256xf32>
    %103 = arith.select %101, %99, %102 : vector<8x256xi1>, vector<8x256xf32>
    %c40_74 = arith.constant 40 : index
    %c0_75 = arith.constant 0 : index
    %104 = vector.load %arg8[%c40_74, %c0_75] : memref<72x256xf32, #tpu.memory_space<vmem>>, vector<8x256xf32>
    tpu.vector_store %arg8[%c40_74, %c0_75], %103 {strides = array<i32>} : memref<72x256xf32, #tpu.memory_space<vmem>>, vector<8x256xf32>,
    %c0_76 = arith.constant 0 : index
    %c32_77 = arith.constant 32 : index
    %105 = vector.load %arg7[%c0_76, %c32_77] : memref<8x290xf32, #tpu.memory_space<vmem>>, vector<8x256xf32>
    %cst_78 = arith.constant 0.000000e+00 : f32
    %106 = vector.shape_cast %20 : vector<1x256xi1> to vector<1x256xi1>
    %107 = vector.broadcast %106 : vector<1x256xi1> to vector<8x256xi1>
    %108 = vector.broadcast %cst_78 : f32 to vector<8x256xf32>
    %109 = arith.select %107, %105, %108 : vector<8x256xi1>, vector<8x256xf32>
    %c48_79 = arith.constant 48 : index
    %c0_80 = arith.constant 0 : index
    %110 = vector.load %arg8[%c48_79, %c0_80] : memref<72x256xf32, #tpu.memory_space<vmem>>, vector<8x256xf32>
    tpu.vector_store %arg8[%c48_79, %c0_80], %109 {strides = array<i32>} : memref<72x256xf32, #tpu.memory_space<vmem>>, vector<8x256xf32>,
    %c0_81 = arith.constant 0 : index
    %c33_82 = arith.constant 33 : index
    %111 = vector.load %arg7[%c0_81, %c33_82] : memref<8x290xf32, #tpu.memory_space<vmem>>, vector<8x256xf32>
    %c56_83 = arith.constant 56 : index
    %c0_84 = arith.constant 0 : index
    %112 = vector.load %arg8[%c56_83, %c0_84] : memref<72x256xf32, #tpu.memory_space<vmem>>, vector<8x256xf32>
    tpu.vector_store %arg8[%c56_83, %c0_84], %111 {strides = array<i32>} : memref<72x256xf32, #tpu.memory_space<vmem>>, vector<8x256xf32>,
    %c0_85 = arith.constant 0 : index
    %c34_86 = arith.constant 34 : index
    %113 = vector.load %arg7[%c0_85, %c34_86] : memref<8x290xf32, #tpu.memory_space<vmem>>, vector<8x256xf32>
    %cst_87 = arith.constant 0.000000e+00 : f32
    %114 = vector.shape_cast %22 : vector<1x256xi1> to vector<1x256xi1>
    %115 = vector.broadcast %114 : vector<1x256xi1> to vector<8x256xi1>
    %116 = vector.broadcast %cst_87 : f32 to vector<8x256xf32>
    %117 = arith.select %115, %113, %116 : vector<8x256xi1>, vector<8x256xf32>
    %c64_88 = arith.constant 64 : index
    %c0_89 = arith.constant 0 : index
    %118 = vector.load %arg8[%c64_88, %c0_89] : memref<72x256xf32, #tpu.memory_space<vmem>>, vector<8x256xf32>
    tpu.vector_store %arg8[%c64_88, %c0_89], %117 {strides = array<i32>} : memref<72x256xf32, #tpu.memory_space<vmem>>, vector<8x256xf32>,
    %c0_90 = arith.constant 0 : index
    %c0_91 = arith.constant 0 : index
    %119 = vector.load %arg4[%c0_90, %c0_91] : memref<3x72xf32, #tpu.memory_space<vmem>>, vector<3x72xf32>
    %c0_92 = arith.constant 0 : index
    %c0_93 = arith.constant 0 : index
    %120 = vector.load %arg8[%c0_92, %c0_93] : memref<72x256xf32, #tpu.memory_space<vmem>>, vector<72x256xf32>
    %cst_94 = arith.constant dense<0.000000e+00> : vector<3x256xf32>
    %121 = tpu.matmul %119, %120, %cst_94 {dimension_numbers = #tpu.dot_dimension_numbers<[1], [0], [0], [1], [0, 0, 1, 1], [], []>, precision = #tpu.contract_precision<fp32>} : vector<3x72xf32>, vector<72x256xf32>, vector<3x256xf32> -> vector<3x256xf32>
    %c0_95 = arith.constant 0 : index
    %c0_96 = arith.constant 0 : index
    %122 = vector.load %arg5[%c0_95, %c0_96] : memref<3x1xf32, #tpu.memory_space<vmem>>, vector<3x1xf32>
    %123 = vector.broadcast %122 : vector<3x1xf32> to vector<3x256xf32>
    %124 = arith.addf %121, %123 : vector<3x256xf32>
    %cst_97 = arith.constant 0.000000e+00 : f32
    %125 = vector.broadcast %cst_97 : f32 to vector<3x256xf32>
    %126 = arith.maximumf %124, %125 : vector<3x256xf32>
    %127 = arith.addf %126, %1 : vector<3x256xf32>
    %c0_98 = arith.constant 0 : index
    %c0_99 = arith.constant 0 : index
    %c0_100 = arith.constant 0 : index
    %128 = vector.load %arg6[%c0_98, %c0_99, %c0_100] : memref<1x3x256xf32, #tpu.memory_space<vmem>>, vector<1x3x256xf32>
    %129 = vector.shape_cast %128 : vector<1x3x256xf32> to vector<3x256xf32>
    %130 = vector.shape_cast %127 : vector<3x256xf32> to vector<1x3x256xf32>
    tpu.vector_store %arg6[%c0_98, %c0_99, %c0_100], %130 {strides = array<i32>} : memref<1x3x256xf32, #tpu.memory_space<vmem>>, vector<1x3x256xf32>,
    return
  }
  func.func @transform_0(%arg0: i32) -> (i32, i32, i32) {
    %c0_i32 = arith.constant 0 : i32
    %c0_i32_0 = arith.constant 0 : i32
    %c0_i32_1 = arith.constant 0 : i32
    return %arg0, %c0_i32, %c0_i32_0 : i32, i32, i32
  }
  func.func @transform_1(%arg0: i32) -> (i32, i32) {
    %c0_i32 = arith.constant 0 : i32
    %c0_i32_0 = arith.constant 0 : i32
    %c0_i32_1 = arith.constant 0 : i32
    return %c0_i32, %c0_i32_0 : i32, i32
  }
  func.func @transform_2(%arg0: i32) -> (i32, i32) {
    %c0_i32 = arith.constant 0 : i32
    %c0_i32_0 = arith.constant 0 : i32
    %c0_i32_1 = arith.constant 0 : i32
    return %c0_i32, %c0_i32_0 : i32, i32
  }
  func.func @transform_3(%arg0: i32) -> (i32, i32) {
    %c0_i32 = arith.constant 0 : i32
    %c0_i32_0 = arith.constant 0 : i32
    %c0_i32_1 = arith.constant 0 : i32
    return %c0_i32, %c0_i32_0 : i32, i32
  }
  func.func @transform_4(%arg0: i32) -> (i32, i32) {
    %c0_i32 = arith.constant 0 : i32
    %c0_i32_0 = arith.constant 0 : i32
    %c0_i32_1 = arith.constant 0 : i32
    return %c0_i32, %c0_i32_0 : i32, i32
  }
  func.func @transform_5(%arg0: i32) -> (i32, i32, i32) {
    %c0_i32 = arith.constant 0 : i32
    %c0_i32_0 = arith.constant 0 : i32
    %c0_i32_1 = arith.constant 0 : i32
    return %arg0, %c0_i32, %c0_i32_0 : i32, i32, i32
  }
}

</mosaic_0001>

<bundles_post_ra>
// kernel: tpu_custom_call.1
= control target key start
LH: loop header
LB: loop body
LE: loop exit
PB: predicated region body
PF: predicated region fallthrough
CT: control target
= control target key end

     0   :  { %s1842_s18 = smov 0   ;;  %s2692_s0 = inlined_call_operand.vmem [shape: f32[2,3,256], index: 0, kind: input, shape index: {}]   ;;  %s2693_s1 = inlined_call_operand.vmem [shape: f32[8,72], index: 1, kind: input, shape index: {}]   ;;  %s2694_s2 = inlined_call_operand.vmem [shape: f32[8,1], index: 2, kind: input, shape index: {}]   ;;  %s2695_s3 = inlined_call_operand.vmem [shape: f32[3,72], index: 3, kind: input, shape index: {}]   ;;  %s2696_s4 = inlined_call_operand.vmem [shape: f32[3,1], index: 4, kind: input, shape index: {}]   ;;  %s2697_s5 = inlined_call_operand.vmem [shape: f32[2,3,256], index: 5, kind: output, shape index: {}]  }
   0x1 LB: > { %s1759_s19 = sadd.s32 4294967295, %s1799_s18   ;;  %p1763_p0 = scmp.ge.s32.totalorder %s1799_s18, 1  ;;  %s1799_s18 = sphi %s1842_s18, %s15_s18  }
   0x2   : > { %p187_p1 = scmp.lt.s32.totalorder %s1799_s18, 3 }
   0x4   : > { %p188_p2 = pnand %p1763_p0, %p187_p1 }
   0x5   : > { %p215_p3 = scmp.lt.s32.totalorder (!%p188_p2), %s1759_s19, 1  ;;  %s1802_s24 = smov (!%p188_p2), 17  }
   0x6   : > { %191 = sbr.rel (%p188_p2) target bundleno = 971 (0x3cb), region = 40  ;;  %s1803_s25 = smov (!%p188_p2), 94  }
   0x7   : > { %s1804_s26 = smov (!%p188_p2), 95   ;;  %s1805_s27 = smov (!%p188_p2), 96  }
   0x8   : > { %s1806_s28 = smov (!%p188_p2), 110   ;;  %s1807_s29 = smov (!%p188_p2), 111  }
   0x9   : > { %s1808_s30 = smov (!%p188_p2), 112   ;;  %s1809_s6 = smov (!%p188_p2), 126  }
   0xa   : > { %s1810_s7 = smov (!%p188_p2), 127  }
   0xb   : > { %v1801_v0 = vmov 0.0   ;;  %s2707_s19 = smov (!%p215_p3, %s1759_s19), 1  ;;  %vm259_vm0 = vcmask 277504   ;;  %vm274_vm1 = vcmask 1042568   ;;  %vm269_vm2 = vcmask 138240  }
   0xc   : > { %257 = vst [vmem:[#allocation2] sm:$0xff] %v1801_v0  ;;  %s1770_s20 = sshll.u32 %s2707_s19, 3  ;;  %vm277_vm3 = vcmask 133120   ;;  %vm427_vm4 = vcmask 777216   ;;  %v226_v21 = vlaneseq  ;;  %vm385_vm5 = vcmask 900096  }
   0xd   : > { %258 = vst [vmem:[#allocation2 + $0x8] sm:$0xff] %v1801_v0  ;;  %s219_s23 = scalar_lea.vmem %s2692_s0, %s1770_s20  ;;  %vm446_vm7 = vcmask 769024   ;;  %vm345_vm8 = vcmask 916480   ;;  %vm366_vm9 = vcmask 908288   ;;  %vm324_vm10 = vcmask 1031168   ;;  %s224_s21 = scalar_lea.vmem %s2697_s5, %s1770_s20 }
   0xe   : > { %v225_v1 = vld [vmem:[%s219_s23] sm:$0x77]  ;;  %260 = vst.msk [vmem:[#allocation2 + $0x10] sm:$0xff] %vm259_vm0, %v1801_v0  ;;  %v227_v24 = vand.u32 127, %v226_v21  ;;  %vm406_vm13 = vcmask 785408   ;;  %vm301_vm15 = vcmask 1039360  }
   0xf   : > { %262 = vst [vmem:[#allocation1] ss:$2 sm:$0xff] %v225_v1  ;;  %vm480_vm0 = vcmask 588800  }
  0x10   : > { %v233_v28 = vand.u32 15, %v227_v24  ;;  %v228_v29 = vadd.s32 128, %v227_v24 }
  0x12   : > { %vm1919_vm6 = vcmp.le.s32.totalorder %v233_v28, 14  ;;  %v240_v34 = vand.u32 15, %v228_v29  ;;  %vm1947_vm12 = vcmp.ge.s32.totalorder %v233_v28, 1 }
  0x14   : > { %vm1934_vm11 = vcmp.le.s32.totalorder %v240_v34, 14  ;;  %vm1968_vm14 = vcmp.ge.s32.totalorder %v240_v34, 1 }
  0x16   : > { %v263_v2 = vld.sshfl [vmem:[#allocation1] sm:$0xff pattern:$0x75316420]  ;;  %v264_v3 = vld.sshfl [vmem:[#allocation1 + $0x8] sm:$0xff pattern:$0x75316420] }
  0x17   : > { %265 = vrot.lane.b32.xlu0 %v263_v2, %s1802_s24  ;;  %1690 = vst [vmem:[#allocation1] ss:$2 sm:$0xff] %v225_v1 }
  0x1f   : > { %267 = vrot.lane.b32.xlu0 %v264_v3, %s1802_s24 }
  0x89   : > { %v266_v4 = vpop.permute.xlu0 %265 }
  0x8a   : > { %275 = vst.msk [vmem:[#allocation2] sm:$0x7] %vm274_vm1, %v266_v4  ;;  %vm996_vm1 = vcmask 1047688  }
  0x91   : > { %v268_v5 = vpop.permute.xlu0 %267  ;;  %v1860_v6 = vld [vmem:[#allocation2] sm:$0xff] }
  0x92   : > { %v270_v7 = vsel %vm269_vm2, %v266_v4, %v268_v5  ;;  %278 = vst.msk [vmem:[#allocation2 + $0x10] sm:$0x7] %vm277_vm3, %v268_v5  ;;  %440 = vrot.lane.b32.xlu1 %v1860_v6, %s1803_s25  ;;  %421 = vrot.lane.b32.xlu2 %v1860_v6, %s1804_s26  ;;  %v285_v58 = vsel %vm1947_vm12, %v1860_v6, 0.0 }
  0x93   : > { %276 = vst [vmem:[#allocation2 + $0x8] sm:$0x7] %v270_v7  ;;  %400 = vrot.lane.b32.xlu0 %v1860_v6, %s1805_s27 }
  0x99   : > { %v436_v8 = vld [vmem:[#allocation2 + $0x10] sm:$0xff] }
  0x9a   : > { %379 = vrot.lane.b32.xlu2 %v1860_v6, %s1806_s28  ;;  %444 = vrot.lane.b32.xlu1 %v436_v8, %s1803_s25  ;;  %v1878_v9 = vld [vmem:[#allocation2 + $0x8] sm:$0xff] }
  0x9b   : > { %425 = vrot.lane.b32.xlu0 %v436_v8, %s1804_s26 }
  0xa2   : > { %360 = vrot.lane.b32.xlu2 %v1860_v6, %s1807_s29  ;;  %339 = vrot.lane.b32.xlu1 %v1860_v6, %s1808_s30 }
  0xa3   : > { %404 = vrot.lane.b32.xlu0 %v436_v8, %s1805_s27 }
  0xaa   : > { %318 = vrot.lane.b32.xlu1 %v1860_v6, %s1809_s6  ;;  %423 = vrot.lane.b32.xlu2 %v1878_v9, %s1804_s26 }
  0xab   : > { %381 = vrot.lane.b32.xlu0 %v1878_v9, %s1806_s28 }
  0xb2   : > { %442 = vrot.lane.b32.xlu1 %v1878_v9, %s1803_s25  ;;  %295 = vrot.lane.b32.xlu2 %v1860_v6, %s1810_s7 }
  0xb3   : > { %362 = vrot.lane.b32.xlu0 %v1878_v9, %s1807_s29 }
  0xba   : > { %402 = vrot.lane.b32.xlu1 %v1878_v9, %s1805_s27  ;;  %341 = vrot.lane.b32.xlu2 %v1878_v9, %s1808_s30 }
  0xbb   : > { %297 = vrot.lane.b32.xlu0 %v1878_v9, %s1810_s7 }
  0xc2   : > { %383 = vrot.lane.b32.xlu1 %v436_v8, %s1806_s28  ;;  %320 = vrot.lane.b32.xlu2 %v1878_v9, %s1809_s6 }
  0xc3   : > { %322 = vrot.lane.b32.xlu0 %v436_v8, %s1809_s6 }
  0xca   : > { %364 = vrot.lane.b32.xlu1 %v436_v8, %s1807_s29  ;;  %343 = vrot.lane.b32.xlu2 %v436_v8, %s1808_s30 }
  0xd2   : > { %299 = vrot.lane.b32.xlu1 %v436_v8, %s1810_s7  ;;  %v2008_v8 = vand.u32 4294901760, %v285_v58 }
  0xec   : > { %v422_v10 = vpop.permute.xlu2 %421 }
  0xf4   : > { %v380_v11 = vpop.permute.xlu2 %379 }
  0xfc   : > { %v361_v12 = vpop.permute.xlu2 %360 }
 0x104   : > { %v441_v13 = vpop.permute.xlu1 %440  ;;  %v424_v15 = vpop.permute.xlu2 %423 }
 0x105   : > { %v1905_v14 = vpop.permute.xlu0 %400  ;;  %v428_v23 = vsel %vm427_vm4, %v422_v10, %v424_v15 }
 0x106   : > { %v1914_v27 = vand.u32 4294901760, %v428_v23 }
 0x108   : > { %v1917_v30 = vsub.f32 %v428_v23, %v1914_v27 }
 0x10a   : > { %v533_v42 = vand.u32 4294901760, %v1917_v30 }
 0x10c   : > { %v445_v16 = vpop.permute.xlu1 %444  ;;  %v1907_v18 = vpop.permute.xlu2 %295  ;;  %v534_v57 = vsub.f32 %v1917_v30, %v533_v42 }
 0x10d   : > { %v426_v17 = vpop.permute.xlu0 %425 }
 0x10e   : > { %v429_v43 = vsel %vm427_vm4, %v424_v15, %v426_v17 }
 0x10f   : > { %v1961_v52 = vand.u32 4294901760, %v429_v43 }
 0x111   : > { %v2001_v4 = vsub.f32 %v429_v43, %v1961_v52 }
 0x113   : > { %v783_v28 = vand.u32 4294901760, %v2001_v4 }
 0x114   : > { %v340_v19 = vpop.permute.xlu1 %339  ;;  %v1909_v22 = vpop.permute.xlu2 %341 }
 0x115   : > { %v405_v20 = vpop.permute.xlu0 %404  ;;  %v346_v39 = vsel %vm345_vm8, %v340_v19, %v1909_v22 }
 0x116   : > { %v350_v49 = vsel %vm1947_vm12, %v346_v39, 0.0 }
 0x117   : > { %v1981_v59 = vand.u32 4294901760, %v350_v49 }
 0x11c   : > { %v319_v25 = vpop.permute.xlu1 %318  ;;  %v1925_v33 = vpop.permute.xlu2 %320 }
 0x11d   : > { %v1912_v26 = vpop.permute.xlu0 %381  ;;  %v325_v50 = vsel %vm324_vm10, %v319_v25, %v1925_v33  ;;  %v2041_v25 = vsub.f32 %v285_v58, %v2008_v8 }
 0x11e   : > { %v386_v32 = vsel %vm385_vm5, %v380_v11, %v1912_v26  ;;  %v329_v60 = vsel %vm1919_vm6, %v325_v50, 0.0 }
 0x11f   : > { %v390_v36 = vsel %vm1919_vm6, %v386_v32, 0.0  ;;  %v2020_v15 = vand.u32 4294901760, %v329_v60 }
 0x120   : > { %v1951_v48 = vand.u32 4294901760, %v390_v36 }
 0x121   : > { %v2045_v29 = vsub.f32 %v329_v60, %v2020_v15 }
 0x122   : > { %v1986_v61 = vsub.f32 %v390_v36, %v1951_v48 }
 0x124   : > { %v443_v35 = vpop.permute.xlu1 %442  ;;  %v344_v5 = vpop.permute.xlu2 %343 }
 0x125   : > { %v447_v37 = vsel %vm446_vm7, %v441_v13, %v443_v35  ;;  %v1930_v38 = vpop.permute.xlu0 %362  ;;  %v448_v44 = vsel %vm446_vm7, %v443_v35, %v445_v16  ;;  %v535_v16 = vand.u32 4294901760, %v534_v57  ;;  %v347_v19 = vsel %vm345_vm8, %v1909_v22, %v344_v5 }
 0x126   : > { %v451_v41 = vsel %vm1919_vm6, %v447_v37, 0.0  ;;  %v367_v46 = vsel %vm366_vm9, %v361_v12, %v1930_v38  ;;  %v452_v53 = vsel %vm1934_vm11, %v448_v44, 0.0  ;;  %v351_v32 = vsel %vm1968_vm14, %v347_v19, 0.0  ;;  %v455_v44 = vld [vmem:[%s2693_s1] sm:$0xff] }
 0x127   : > { %v1943_v45 = vand.u32 4294901760, %v451_v41  ;;  %v1965_v54 = vand.u32 4294901760, %v367_v46  ;;  %v1989_v63 = vand.u32 4294901760, %v452_v53  ;;  %v784_v19 = vsub.f32 %v2001_v4, %v783_v28 }
 0x129   : > { %v1958_v51 = vsub.f32 %v451_v41, %v1943_v45  ;;  %492 = vmatpush.msra.mxu0 %v1943_v45  ;;  %632 = vmatpush.msra.mxu3 %v1943_v45  ;;  %v2004_v6 = vsub.f32 %v367_v46, %v1965_v54  ;;  %v2023_v17 = vsub.f32 %v452_v53, %v1989_v63 }
 0x12b   : > { %494 = vmatpush.msra.mxu0 %v1914_v27  ;;  %593 = vmatpush.msra.mxu2 %v1958_v51  ;;  %v527_v56 = vand.u32 4294901760, %v1958_v51  ;;  %v551_v22 = vand.u32 4294901760, %v2004_v6  ;;  %v777_v43 = vand.u32 4294901760, %v2023_v17 }
 0x12c   : > { %634 = vmatpush.msra.mxu3 %v1914_v27  ;;  %v403_v62 = vpop.permute.xlu1 %402 }
 0x12d   : > { %v407_v0 = vsel %vm406_vm13, %v1905_v14, %v403_v62  ;;  %v408_v1 = vsel %vm406_vm13, %v403_v62, %v405_v20  ;;  %v1994_v2 = vpop.permute.xlu0 %297  ;;  %596 = vmatpush.msra.mxu2 %v1917_v30  ;;  %v528_v3 = vsub.f32 %v1958_v51, %v527_v56  ;;  %v2018_v14 = vsub.f32 %v350_v49, %v1981_v59 }
 0x12e   : > { %v411_v7 = vsel %vm1947_vm12, %v407_v0, 0.0  ;;  %v412_v10 = vsel %vm1968_vm14, %v408_v1, 0.0  ;;  %v302_v12 = vsel %vm301_vm15, %v1907_v18, %v1994_v2  ;;  %v545_v18 = vand.u32 4294901760, %v1986_v61 }
 0x12f   : > { %v2012_v11 = vand.u32 4294901760, %v411_v7  ;;  %v529_v13 = vand.u32 4294901760, %v528_v3  ;;  %v2032_v21 = vand.u32 4294901760, %v412_v10  ;;  %v2034_v23 = vand.u32 4294901760, %v302_v12 }
 0x130   : > { %v557_v35 = vand.u32 4294901760, %v2018_v14  ;;  %v546_v41 = vsub.f32 %v1986_v61, %v545_v18  ;;  %v552_v60 = vsub.f32 %v2004_v6, %v551_v22  ;;  %v2085_v62 = vand.u32 4294901760, %v351_v32 }
 0x131   : > { %v2028_v20 = vsub.f32 %v411_v7, %v2012_v11  ;;  %496 = vmatpush.msra.mxu0 %v2012_v11  ;;  %530 = vmatpush.msra.mxu1 %v529_v13  ;;  %v2066_v46 = vsub.f32 %v412_v10, %v2032_v21  ;;  %v482_v0 = vsel %vm480_vm0, %v455_v44, 0  ;;  %v778_v5 = vsub.f32 %v2023_v17, %v777_v43 }
 0x132   : > { %636 = vmatpush.msra.mxu3 %v2012_v11  ;;  %v547_v3 = vand.u32 4294901760, %v546_v41  ;;  %v558_v7 = vsub.f32 %v2018_v14, %v557_v35 }
 0x133   : > { %498 = vmatpush.msra.mxu0 %v1951_v48  ;;  %536 = vmatpush.msra.mxu1 %v535_v16  ;;  %v539_v24 = vand.u32 4294901760, %v2028_v20  ;;  %v553_v16 = vand.u32 4294901760, %v552_v60 }
 0x134   : > { %599 = vmatpush.msra.mxu2 %v2028_v20  ;;  %638 = vmatpush.msra.mxu3 %v1951_v48  ;;  %v384_v34 = vpop.permute.xlu1 %383 }
 0x135   : > { %v387_v36 = vsel %vm385_vm5, %v1912_v26, %v384_v34  ;;  %v323_v37 = vpop.permute.xlu0 %322  ;;  %500 = vmatpush.msra.mxu0 %v1965_v54  ;;  %v540_v39 = vsub.f32 %v2028_v20, %v539_v24  ;;  %v2069_v26 = vsub.f32 %v302_v12, %v2034_v23  ;;  %v789_v12 = vand.u32 4294901760, %v2066_v46 }
 0x136   : > { %v391_v49 = vsel %vm1934_vm11, %v387_v36, 0.0  ;;  %v326_v50 = vsel %vm324_vm10, %v1925_v33, %v323_v37  ;;  %602 = vmatpush.msra.mxu2 %v1986_v61  ;;  %640 = vmatpush.msra.mxu3 %v1965_v54  ;;  %v563_v33 = vand.u32 4294901760, %v2045_v29  ;;  %v575_v34 = vand.u32 4294901760, %v2041_v25 }
 0x137   : > { %v2077_v53 = vand.u32 4294901760, %v391_v49  ;;  %v330_v57 = vsel %vm1934_vm11, %v326_v50, 0.0  ;;  %502 = vmatpush.msra.mxu0 %v1981_v59  ;;  %v541_v58 = vand.u32 4294901760, %v540_v39  ;;  %v569_v13 = vand.u32 4294901760, %v2069_v26 }
 0x138   : > { %605 = vmatpush.msra.mxu2 %v2004_v6  ;;  %642 = vmatpush.msra.mxu3 %v1981_v59  ;;  %v2101_v10 = vand.u32 4294901760, %v330_v57  ;;  %v2112_v36 = vand.u32 4294901760, %v482_v0  ;;  %v2115_v37 = vsub.f32 %v351_v32, %v2085_v62  ;;  %v564_v41 = vsub.f32 %v2045_v29, %v563_v33 }
 0x139   : > { %v2092_v1 = vsub.f32 %v391_v49, %v2077_v53  ;;  %504 = vmatpush.msra.mxu0 %v2020_v15  ;;  %542 = vmatpush.msra.mxu1 %v541_v58  ;;  %v779_v50 = vand.u32 4294901760, %v778_v5  ;;  %v559_v32 = vand.u32 4294901760, %v558_v7  ;;  %v576_v5 = vsub.f32 %v2041_v25, %v575_v34 }
 0x13a   : > { %608 = vmatpush.msra.mxu2 %v2018_v14  ;;  %644 = vmatpush.msra.mxu3 %v2020_v15  ;;  %v2127_v58 = vsub.f32 %v330_v57, %v2101_v10  ;;  %v785_v57 = vand.u32 4294901760, %v784_v19  ;;  %v2145_v7 = vsub.f32 %v482_v0, %v2112_v36  ;;  %v565_v51 = vand.u32 4294901760, %v564_v41 }
 0x13b   : > { %506 = vmatpush.msra.mxu0 %v2034_v23  ;;  %548 = vmatpush.msra.mxu1 %v547_v3  ;;  %v795_v44 = vand.u32 4294901760, %v2092_v1  ;;  %v790_v3 = vsub.f32 %v2066_v46, %v789_v12  ;;  %v807_v19 = vand.u32 4294901760, %v2115_v37 }
 0x13c   : > { %611 = vmatpush.msra.mxu2 %v2045_v29  ;;  %646 = vmatpush.msra.mxu3 %v2034_v23  ;;  %v365_v39 = vpop.permute.xlu1 %364  ;;  %v2167_v41 = vand.u32 4294901760, %v2145_v7 }
 0x13d   : > { %v368_v49 = vsel %vm366_vm9, %v1930_v38, %v365_v39  ;;  %508 = vmatpush.msra.mxu0 %v2008_v8  ;;  %554 = vmatpush.msra.mxu1 %v553_v16  ;;  %v570_v38 = vsub.f32 %v2069_v26, %v569_v13  ;;  %v286_v16 = vsel %vm1968_vm14, %v1878_v9, 0.0  ;;  %v791_v9 = vand.u32 4294901760, %v790_v3 }
 0x13e   : > { %v2129_v60 = vand.u32 4294901760, %v368_v49  ;;  %614 = vmatpush.msra.mxu2 %v2069_v26  ;;  %648 = vmatpush.msra.mxu3 %v2008_v8  ;;  %v2169_v30 = vand.u32 4294901760, %v286_v16  ;;  %v577_v3 = vand.u32 4294901760, %v576_v5  ;;  %v808_v20 = vsub.f32 %v2115_v37, %v807_v19 }
 0x13f   : > { %666 = vmatpush.msrb.mxu0 %v527_v56  ;;  %560 = vmatpush.msra.mxu1 %v559_v32  ;;  %v796_v56 = vsub.f32 %v2092_v1, %v795_v44  ;;  %v571_v0 = vand.u32 4294901760, %v570_v38  ;;  %v512_v61 = vsub.f32 %v2145_v7, %v2167_v41 }
 0x140   : > { %780 = vmatpush.msrb.mxu3 %v779_v50  ;;  %v2151_v39 = vsub.f32 %v368_v49, %v2129_v60  ;;  %617 = vmatpush.msra.mxu2 %v2041_v25  ;;  %v813_v50 = vand.u32 4294901760, %v2127_v58 }
 0x141   : > { %670 = vmatpush.msrb.mxu0 %v533_v42  ;;  %566 = vmatpush.msra.mxu1 %v565_v51  ;;  %v797_v32 = vand.u32 4294901760, %v796_v56  ;;  %v809_v56 = vand.u32 4294901760, %v808_v20 }
 0x142   : > { %742 = vmatpush.msrb.mxu2 %v1989_v63  ;;  %786 = vmatpush.msrb.mxu3 %v785_v57  ;;  %v801_v49 = vand.u32 4294901760, %v2151_v39  ;;  %v814_v51 = vsub.f32 %v2127_v58, %v813_v50 }
 0x143   : > { %674 = vmatpush.msrb.mxu0 %v539_v24  ;;  %572 = vmatpush.msra.mxu1 %v571_v0  ;;  %v1179_v0 = vld [vmem:[%s2696_s4] sm:$0x7] }
 0x144   : > { %744 = vmatpush.msrb.mxu2 %v1961_v52  ;;  %792 = vmatpush.msrb.mxu3 %v791_v9  ;;  %v300_v42 = vpop.permute.xlu1 %299  ;;  %v802_v38 = vsub.f32 %v2151_v39, %v801_v49 }
 0x145   : > { %v303_v24 = vsel %vm301_vm15, %v1994_v2, %v300_v42  ;;  %678 = vmatpush.msrb.mxu0 %v545_v18  ;;  %578 = vmatpush.msra.mxu1 %v577_v3  ;;  %v2193_v2 = vsub.f32 %v286_v16, %v2169_v30 }
 0x146   : > { %746 = vmatpush.msrb.mxu2 %v2032_v21  ;;  %v2182_v57 = vand.u32 4294901760, %v303_v24  ;;  %798 = vmatpush.msrb.mxu3 %v797_v32  ;;  %v803_v5 = vand.u32 4294901760, %v802_v38 }
 0x147   : > { %682 = vmatpush.msrb.mxu0 %v551_v22  ;;  %712 = vmatpush.msrb.mxu1 %v1943_v45  ;;  %v815_v45 = vand.u32 4294901760, %v814_v51  ;;  %v513_v22 = vand.u32 4294901760, %v512_v61  ;;  %v825_v16 = vand.u32 4294901760, %v2193_v2 }
 0x148   : > { %v2196_v18 = vsub.f32 %v303_v24, %v2182_v57  ;;  %748 = vmatpush.msrb.mxu2 %v2077_v53  ;;  %804 = vmatpush.msrb.mxu3 %v803_v5 }
 0x149   : > { %686 = vmatpush.msrb.mxu0 %v557_v35  ;;  %714 = vmatpush.msrb.mxu1 %v1914_v27 }
 0x14a   : > { %750 = vmatpush.msrb.mxu2 %v2129_v60  ;;  %810 = vmatpush.msrb.mxu3 %v809_v56  ;;  %v819_v6 = vand.u32 4294901760, %v2196_v18 }
 0x14b   : > { %690 = vmatpush.msrb.mxu0 %v563_v33  ;;  %716 = vmatpush.msrb.mxu1 %v2012_v11  ;;  %v826_v11 = vsub.f32 %v2193_v2, %v825_v16 }
 0x14c   : > { %752 = vmatpush.msrb.mxu2 %v2085_v62  ;;  %816 = vmatpush.msrb.mxu3 %v815_v45  ;;  %v820_v14 = vsub.f32 %v2196_v18, %v819_v6 }
 0x14d   : > { %620 = vmatmul.f32.vlgmr.msra.gmra.mxu2 %v2145_v7  ;;  %694 = vmatpush.msrb.mxu0 %v569_v13 }
 0x14e   : > { %718 = vmatpush.msrb.mxu1 %v1951_v48  ;;  %754 = vmatpush.msrb.mxu2 %v2101_v10  ;;  %v821_v27 = vand.u32 4294901760, %v820_v14  ;;  %v827_v48 = vand.u32 4294901760, %v826_v11 }
 0x14f   : > { %514 = vmatmul.f32.vlgmr.msra.gmra.mxu0 %v513_v22  ;;  %652 = vmatmul.f32.vlgmr.msra.gmra.mxu3 %v2167_v41 }
 0x150   : > { %698 = vmatpush.msrb.mxu0 %v575_v34  ;;  %720 = vmatpush.msrb.mxu1 %v1965_v54  ;;  %v1811_v54 = vmov 0  }
 0x151   : > { %756 = vmatpush.msrb.mxu2 %v2182_v57  ;;  %580 = vmatmul.f32.vlgmr.msra.gmra.mxu1 %v2112_v36 }
 0x152   : > { %843 = vmatpush.msra.mxu0 %v2023_v17  ;;  %722 = vmatpush.msrb.mxu1 %v1981_v59 }
 0x153   : > { %758 = vmatpush.msrb.mxu2 %v2169_v30  ;;  %822 = vmatpush.msrb.mxu3 %v821_v27 }
 0x154   : > { %846 = vmatpush.msra.mxu0 %v2001_v4  ;;  %724 = vmatpush.msrb.mxu1 %v2020_v15 }
 0x155   : > { %916 = vmatpush.msra.mxu2 %v777_v43  ;;  %828 = vmatpush.msrb.mxu3 %v827_v48 }
 0x156   : > { %849 = vmatpush.msra.mxu0 %v2066_v46  ;;  %726 = vmatpush.msrb.mxu1 %v2034_v23 }
 0x157   : > { %920 = vmatpush.msra.mxu2 %v783_v28  ;;  %962 = vmatpush.msra.mxu3 %v1989_v63 }
 0x158   : > { %764 = vmatmul.f32.vlgmr.msrb.gmra.mxu2 %v513_v22  ;;  %700 = vmatmul.f32.vlgmr.msrb.gmra.mxu0 %v2112_v36 }
 0x159   : > { %852 = vmatpush.msra.mxu0 %v2092_v1  ;;  %924 = vmatpush.msra.mxu2 %v789_v12 }
 0x15a   : > { %964 = vmatpush.msra.mxu3 %v1961_v52  ;;  %728 = vmatpush.msrb.mxu1 %v2008_v8 }
 0x15b   : > { %830 = vmatmul.f32.vlgmr.msrb.gmra.mxu3 %v2112_v36  ;;  %730 = vmatmul.f32.vlgmr.msrb.gmra.mxu1 %v2112_v36 }
 0x15c   : > { %855 = vmatpush.msra.mxu0 %v2151_v39  ;;  %882 = vmatpush.msra.mxu1 %v1989_v63 }
 0x15d   : > { %928 = vmatpush.msra.mxu2 %v795_v44  ;;  %966 = vmatpush.msra.mxu3 %v2032_v21 }
 0x15e   : > { %858 = vmatpush.msra.mxu0 %v2115_v37  ;;  %884 = vmatpush.msra.mxu1 %v1961_v52  ;;  %v474_v52 = vld [vmem:[%s2694_s2] sm:$0xff] }
 0x15f   : > { %932 = vmatpush.msra.mxu2 %v801_v49  ;;  %968 = vmatpush.msra.mxu3 %v2077_v53 }
 0x160   : > { %861 = vmatpush.msra.mxu0 %v2127_v58  ;;  %886 = vmatpush.msra.mxu1 %v2032_v21 }
 0x161   : > { %936 = vmatpush.msra.mxu2 %v807_v19  ;;  %970 = vmatpush.msra.mxu3 %v2129_v60 }
 0x162   : > { %864 = vmatpush.msra.mxu0 %v2196_v18  ;;  %888 = vmatpush.msra.mxu1 %v2077_v53 }
 0x163   : > { %940 = vmatpush.msra.mxu2 %v813_v50  ;;  %972 = vmatpush.msra.mxu3 %v2085_v62 }
 0x164   : > { %867 = vmatpush.msra.mxu0 %v2193_v2  ;;  %890 = vmatpush.msra.mxu1 %v2129_v60 }
 0x165   : > { %944 = vmatpush.msra.mxu2 %v819_v6  ;;  %974 = vmatpush.msra.mxu3 %v2101_v10 }
 0x166   : > { %870 = vmatmul.f32.vlgmr.msra.gmra.mxu0 %v2145_v7  ;;  %892 = vmatpush.msra.mxu1 %v2085_v62 }
 0x167   : > { %948 = vmatpush.msra.mxu2 %v825_v16  ;;  %976 = vmatpush.msra.mxu3 %v2182_v57 }
 0x168   : > { %894 = vmatpush.msra.mxu1 %v2101_v10  ;;  %950 = vmatmul.f32.vlgmr.msra.gmra.mxu2 %v2112_v36 }
 0x169   : > { %978 = vmatpush.msra.mxu3 %v2169_v30  ;;  %1791 = vset.pattern.permute.xlu2 %v1811_v54 }
 0x16a   : > { %896 = vmatpush.msra.mxu1 %v2182_v57  ;;  %980 = vmatmul.f32.vlgmr.msra.gmra.mxu3 %v2112_v36 }
 0x16b   : > { %477 = vperm.xlu2 %1791, %v474_v52   ;;  %1792 = vset.pattern.permute.xlu0 %v1811_v54 }
 0x16c   : > { %898 = vmatpush.msra.mxu1 %v2169_v30 }
 0x16d   : > { %902 = vmatmul.f32.vlgmr.msra.gmra.mxu1 %v2167_v41 }
 0x1c5   : > { %v478_v59 = vpop.permute.xlu2 %477 }
 0x1cc   : > { %v515_v63 = vpop.f32.mrf.mxu0 }
 0x1cd   : > { %v516_v4 = vadd.f32 %v515_v63, %v478_v59  ;;  %v1160_v63 = vld [vmem:[%s2695_s3] sm:$0x7] }
 0x1ce   : > { %v581_v8 = vpop.f32.mrf.mxu1 }
 0x1cf   : > { %v582_v15 = vadd.f32 %v581_v8, %v516_v4 }
 0x1d0   : > { %v621_v17 = vpop.f32.mrf.mxu2 }
 0x1d1   : > { %v622_v21 = vadd.f32 %v621_v17, %v582_v15 }
 0x1d2   : > { %v653_v23 = vpop.f32.mrf.mxu3 }
 0x1d3   : > { %v654_v25 = vadd.f32 %v653_v23, %v622_v21 }
 0x1d5   : > { %v701_v28 = vpop.f32.mrf.mxu0 }
 0x1d6   : > { %v702_v29 = vadd.f32 %v701_v28, %v654_v25 }
 0x1d8   : > { %v731_v35 = vpop.f32.mrf.mxu1 }
 0x1d9   : > { %v732_v43 = vadd.f32 %v731_v35, %v702_v29  ;;  %v1186_v29 = vsel %vm480_vm0, %v1160_v63, 0 }
 0x1db   : > { %v984_v46 = vmax.f32 %v732_v43, 0.0  ;;  %v765_v26 = vpop.f32.mrf.mxu2 }
 0x1dc   : > { %v766_v53 = vadd.f32 %v765_v26, %v478_v59 }
 0x1dd   : > { %988 = vrot.lane.b32.xlu0 %v984_v46, %s1802_s24 }
 0x1de   : > { %v831_v62 = vpop.f32.mrf.mxu3 }
 0x1df   : > { %v832_v1 = vadd.f32 %v831_v62, %v766_v53 }
 0x1e3   : > { %v871_v33 = vpop.f32.mrf.mxu0 }
 0x1e4   : > { %v872_v10 = vadd.f32 %v871_v33, %v832_v1 }
 0x1ea   : > { %v903_v12 = vpop.f32.mrf.mxu1 }
 0x1eb   : > { %v904_v13 = vadd.f32 %v903_v12, %v872_v10  ;;  %v951_v34 = vpop.f32.mrf.mxu2 }
 0x1ed   : > { %v952_v36 = vadd.f32 %v951_v34, %v904_v13  ;;  %v981_v37 = vpop.f32.mrf.mxu3  ;;  %v2402_v13 = vand.u32 4294901760, %v1186_v29 }
 0x1ef   : > { %v982_v44 = vadd.f32 %v981_v37, %v952_v36 }
 0x1f1   : > { %v985_v58 = vmax.f32 %v982_v44, 0.0 }
 0x1f3   : > { %990 = vrot.lane.b32.xlu1 %v985_v58, %s1802_s24 }
 0x24f   : > { %v989_v60 = vpop.permute.xlu0 %988 }
 0x250   : > { %997 = vst.msk [vmem:[#allocation2] sm:$0xff] %vm996_vm1, %v989_v60 }
 0x257   : > { %v2280_v7 = vld [vmem:[#allocation2] sm:$0xff] }
 0x258   : > { %1146 = vrot.lane.b32.xlu2 %v2280_v7, %s1803_s25  ;;  %1128 = vrot.lane.b32.xlu1 %v2280_v7, %s1804_s26 }
 0x259   : > { %1108 = vrot.lane.b32.xlu0 %v2280_v7, %s1805_s27 }
 0x260   : > { %1088 = vrot.lane.b32.xlu2 %v2280_v7, %s1806_s28  ;;  %1050 = vrot.lane.b32.xlu1 %v2280_v7, %s1808_s30 }
 0x265   : > { %v991_v39 = vpop.permute.xlu1 %990 }
 0x266   : > { %v2293_v19 = vsel %vm269_vm2, %v989_v60, %v991_v39  ;;  %999 = vst.msk [vmem:[#allocation2 + $0x10] sm:$0xff] %vm269_vm2, %v991_v39  ;;  %vm1700_vm2 = vcmask 1043456  }
 0x267   : > { %998 = vst [vmem:[#allocation2 + $0x8] sm:$0xff] %v2293_v19 }
 0x268   : > { %1070 = vrot.lane.b32.xlu2 %v2280_v7, %s1807_s29  ;;  %1030 = vrot.lane.b32.xlu1 %v2280_v7, %s1809_s6 }
 0x26d   : > { %v1124_v9 = vld [vmem:[#allocation2 + $0x10] sm:$0xff] }
 0x26e   : > { %1132 = vrot.lane.b32.xlu0 %v1124_v9, %s1804_s26 }
 0x270   : > { %1150 = vrot.lane.b32.xlu1 %v1124_v9, %s1803_s25  ;;  %1130 = vrot.lane.b32.xlu2 %v2293_v19, %s1804_s26 }
 0x276   : > { %1112 = vrot.lane.b32.xlu0 %v1124_v9, %s1805_s27 }
 0x278   : > { %1012 = vrot.lane.b32.xlu2 %v2280_v7, %s1810_s7  ;;  %1110 = vrot.lane.b32.xlu1 %v2293_v19, %s1805_s27 }
 0x27e   : > { %1148 = vrot.lane.b32.xlu0 %v2293_v19, %s1803_s25 }
 0x280   : > { %1092 = vrot.lane.b32.xlu1 %v1124_v9, %s1806_s28  ;;  %1052 = vrot.lane.b32.xlu2 %v2293_v19, %s1808_s30 }
 0x286   : > { %1090 = vrot.lane.b32.xlu0 %v2293_v19, %s1806_s28 }
 0x288   : > { %1074 = vrot.lane.b32.xlu1 %v1124_v9, %s1807_s29  ;;  %1032 = vrot.lane.b32.xlu2 %v2293_v19, %s1809_s6 }
 0x28e   : > { %1072 = vrot.lane.b32.xlu0 %v2293_v19, %s1807_s29 }
 0x290   : > { %1016 = vrot.lane.b32.xlu1 %v1124_v9, %s1810_s7  ;;  %1054 = vrot.lane.b32.xlu2 %v1124_v9, %s1808_s30 }
 0x296   : > { %1014 = vrot.lane.b32.xlu0 %v2293_v19, %s1810_s7 }
 0x298   : > { %1182 = vperm.xlu2 %1791, %v1179_v0  }
 0x29e   : > { %1034 = vrot.lane.b32.xlu0 %v1124_v9, %s1809_s6 }
 0x2b2   : > { %v1147_v49 = vpop.permute.xlu2 %1146 }
 0x2ba   : > { %v1089_v50 = vpop.permute.xlu2 %1088 }
 0x2c2   : > { %v2330_v30 = vpop.permute.xlu2 %1070 }
 0x2ca   : > { %v1129_v41 = vpop.permute.xlu1 %1128  ;;  %v1131_v32 = vpop.permute.xlu2 %1130 }
 0x2cb   : > { %v1109_v3 = vpop.permute.xlu0 %1108  ;;  %v1134_v51 = vsel %vm427_vm4, %v1129_v41, %v1131_v32 }
 0x2cc   : > { %v2336_v18 = vand.u32 4294901760, %v1134_v51 }
 0x2ce   : > { %v2345_v22 = vsub.f32 %v1134_v51, %v2336_v18 }
 0x2d0   : > { %v1237_v54 = vand.u32 4294901760, %v2345_v22 }
 0x2d2   : > { %v1051_v42 = vpop.permute.xlu1 %1050  ;;  %v2332_v24 = vpop.permute.xlu2 %1012  ;;  %v1238_v28 = vsub.f32 %v2345_v22, %v1237_v54 }
 0x2d4   : > { %v1239_v44 = vand.u32 4294901760, %v1238_v28 }
 0x2da   : > { %v1031_v38 = vpop.permute.xlu1 %1030  ;;  %v2338_v56 = vpop.permute.xlu2 %1052 }
 0x2db   : > { %v1056_v52 = vsel %vm345_vm8, %v1051_v42, %v2338_v56 }
 0x2dc   : > { %v1060_v8 = vsel %vm1947_vm12, %v1056_v52, 0.0 }
 0x2dd   : > { %v2388_v26 = vand.u32 4294901760, %v1060_v8 }
 0x2df   : > { %v2417_v39 = vsub.f32 %v1060_v8, %v2388_v26 }
 0x2e0   : > { %v1133_v20 = vpop.permute.xlu0 %1132 }
 0x2e1   : > { %v1135_v36 = vsel %vm427_vm4, %v1131_v32, %v1133_v20 }
 0x2e2   : > { %v1151_v57 = vpop.permute.xlu1 %1150  ;;  %v2366_v4 = vpop.permute.xlu2 %1032 }
 0x2e3   : > { %v1036_v35 = vsel %vm324_vm10, %v1031_v38, %v2366_v4 }
 0x2e4   : > { %v1040_v34 = vsel %vm1919_vm6, %v1036_v35, 0.0 }
 0x2e5   : > { %v2419_v31 = vand.u32 4294901760, %v1040_v34 }
 0x2e8   : > { %v1113_v5 = vpop.permute.xlu0 %1112 }
 0x2ea   : > { %v1111_v61 = vpop.permute.xlu1 %1110 }
 0x2eb   : > { %v1114_v2 = vsel %vm406_vm13, %v1109_v3, %v1111_v61  ;;  %v1115_v53 = vsel %vm406_vm13, %v1111_v61, %v1113_v5  ;;  %v1002_v61 = vsel %vm1947_vm12, %v2280_v7, 0.0 }
 0x2ec   : > { %v1118_v45 = vsel %vm1947_vm12, %v1114_v2, 0.0  ;;  %v1119_v58 = vsel %vm1968_vm14, %v1115_v53, 0.0  ;;  %v2445_v2 = vsub.f32 %v1040_v34, %v2419_v31  ;;  %v2466_v63 = vand.u32 4294901760, %v1002_v61 }
 0x2ed   : > { %v2342_v6 = vand.u32 4294901760, %v1118_v45  ;;  %v2429_v32 = vand.u32 4294901760, %v1119_v58 }
 0x2ee   : > { %v1267_v28 = vand.u32 4294901760, %v2445_v2 }
 0x2ef   : > { %v2351_v11 = vsub.f32 %v1118_v45, %v2342_v6  ;;  %v2462_v7 = vsub.f32 %v1119_v58, %v2429_v32 }
 0x2f0   : > { %v1149_v16 = vpop.permute.xlu0 %1148 }
 0x2f1   : > { %v1152_v14 = vsel %vm446_vm7, %v1147_v49, %v1149_v16  ;;  %v1243_v21 = vand.u32 4294901760, %v2351_v11  ;;  %v1153_v23 = vsel %vm446_vm7, %v1149_v16, %v1151_v57  ;;  %v2424_v49 = vsub.f32 %v1186_v29, %v2402_v13  ;;  %v1055_v57 = vpop.permute.xlu2 %1054 }
 0x2f2   : > { %v1156_v27 = vsel %vm1919_vm6, %v1152_v14, 0.0  ;;  %v1093_v17 = vpop.permute.xlu1 %1092  ;;  %v1157_v33 = vsel %vm1934_vm11, %v1153_v23, 0.0  ;;  %v1261_v16 = vand.u32 4294901760, %v2417_v39  ;;  %v1057_v52 = vsel %vm345_vm8, %v2338_v56, %v1055_v57 }
 0x2f3   : > { %v2353_v48 = vand.u32 4294901760, %v1156_v27  ;;  %v1244_v12 = vsub.f32 %v2351_v11, %v1243_v21  ;;  %v2413_v60 = vand.u32 4294901760, %v1157_v33  ;;  %v2459_v47 = vand.u32 4294901760, %v2424_v49 }
 0x2f4   : > { %v1262_v56 = vsub.f32 %v2417_v39, %v1261_v16  ;;  %v1061_v29 = vsel %vm1968_vm14, %v1057_v52, 0.0 }
 0x2f5   : > { %v2359_v59 = vsub.f32 %v1156_v27, %v2353_v48  ;;  %1196 = vmatpush.msrb.mxu0 %v2353_v48  ;;  %1336 = vmatpush.msrb.mxu3 %v2353_v48  ;;  %v1245_v9 = vand.u32 4294901760, %v1244_v12  ;;  %v2437_v5 = vsub.f32 %v1157_v33, %v2413_v60  ;;  %v1493_v12 = vand.u32 4294901760, %v2462_v7 }
 0x2f7   : > { %v1231_v15 = vand.u32 4294901760, %v2359_v59  ;;  %1198 = vmatpush.msrb.mxu0 %v2336_v18  ;;  %1297 = vmatpush.msrb.mxu2 %v2359_v59  ;;  %v1481_v8 = vand.u32 4294901760, %v2437_v5 }
 0x2f8   : > { %1338 = vmatpush.msrb.mxu3 %v2336_v18  ;;  %v1091_v25 = vpop.permute.xlu0 %1090 }
 0x2f9   : > { %v1094_v43 = vsel %vm385_vm5, %v1089_v50, %v1091_v25  ;;  %1200 = vmatpush.msrb.mxu0 %v2342_v6  ;;  %1300 = vmatpush.msrb.mxu2 %v2345_v22  ;;  %v1232_v46 = vsub.f32 %v2359_v59, %v1231_v15  ;;  %v2426_v50 = vand.u32 4294901760, %v1135_v36  ;;  %v1095_v41 = vsel %vm385_vm5, %v1091_v25, %v1093_v17 }
 0x2fa   : > { %v1098_v62 = vsel %vm1919_vm6, %v1094_v43, 0.0  ;;  %1340 = vmatpush.msrb.mxu3 %v2342_v6  ;;  %v1075_v3 = vpop.permute.xlu1 %1074  ;;  %v1482_v58 = vsub.f32 %v2437_v5, %v1481_v8 }
 0x2fb   : > { %v2396_v1 = vand.u32 4294901760, %v1098_v62  ;;  %1303 = vmatpush.msrb.mxu2 %v2351_v11  ;;  %v1233_v10 = vand.u32 4294901760, %v1232_v46  ;;  %v2451_v14 = vsub.f32 %v1135_v36, %v2426_v50  ;;  %v1216_v46 = vsub.f32 %v2424_v49, %v2459_v47 }
 0x2fc   : > { %v1483_v52 = vand.u32 4294901760, %v1482_v58 }
 0x2fd   : > { %v2408_v37 = vsub.f32 %v1098_v62, %v2396_v1  ;;  %1202 = vmatpush.msrb.mxu0 %v2396_v1  ;;  %1234 = vmatpush.msrb.mxu1 %v1233_v10  ;;  %v1487_v53 = vand.u32 4294901760, %v2451_v14  ;;  %v2496_v10 = vsub.f32 %v1002_v61, %v2466_v63 }
 0x2fe   : > { %1342 = vmatpush.msrb.mxu3 %v2396_v1 }
 0x2ff   : > { %1240 = vmatpush.msrb.mxu1 %v1239_v44  ;;  %1306 = vmatpush.msrb.mxu2 %v2408_v37  ;;  %v1249_v0 = vand.u32 4294901760, %v2408_v37  ;;  %v1488_v57 = vsub.f32 %v2451_v14, %v1487_v53 }
 0x300   : > { %v1073_v42 = vpop.permute.xlu0 %1072 }
 0x301   : > { %v1076_v38 = vsel %vm366_vm9, %v2330_v30, %v1073_v42  ;;  %1246 = vmatpush.msrb.mxu1 %v1245_v9  ;;  %v1250_v20 = vsub.f32 %v2408_v37, %v1249_v0  ;;  %v1099_v30 = vsel %vm1934_vm11, %v1095_v41, 0.0  ;;  %v1077_v23 = vsel %vm366_vm9, %v1073_v42, %v1075_v3 }
 0x302   : > { %v2439_v51 = vand.u32 4294901760, %v1076_v38  ;;  %v2469_v17 = vand.u32 4294901760, %v1099_v30  ;;  %v2490_v62 = vand.u32 4294901760, %v1077_v23  ;;  %v2508_v9 = vand.u32 4294901760, %v1061_v29 }
 0x303   : > { %v1251_v45 = vand.u32 4294901760, %v1250_v20  ;;  %v1263_v41 = vand.u32 4294901760, %v1262_v56  ;;  %v1268_v42 = vsub.f32 %v2445_v2, %v1267_v28  ;;  %v2518_v20 = vand.u32 4294901760, %v1216_v46 }
 0x304   : > { %v2454_v27 = vsub.f32 %v1076_v38, %v2439_v51  ;;  %1204 = vmatpush.msrb.mxu0 %v2439_v51  ;;  %1344 = vmatpush.msrb.mxu3 %v2439_v51  ;;  %v2500_v34 = vsub.f32 %v1099_v30, %v2469_v17  ;;  %v2524_v61 = vsub.f32 %v1077_v23, %v2490_v62  ;;  %v1279_v30 = vand.u32 4294901760, %v2496_v10 }
 0x305   : > { %1252 = vmatpush.msrb.mxu1 %v1251_v45  ;;  %v1003_v45 = vsel %vm1968_vm14, %v2293_v19, 0.0  ;;  %v1494_v56 = vsub.f32 %v2462_v7, %v1493_v12  ;;  %v1269_v55 = vand.u32 4294901760, %v1268_v42 }
 0x306   : > { %1206 = vmatpush.msrb.mxu0 %v2388_v26  ;;  %1309 = vmatpush.msrb.mxu2 %v2454_v27  ;;  %v1255_v25 = vand.u32 4294901760, %v2454_v27  ;;  %v1499_v23 = vand.u32 4294901760, %v2500_v34  ;;  %v1280_v58 = vsub.f32 %v2496_v10, %v1279_v30 }
 0x307   : > { %1346 = vmatpush.msrb.mxu3 %v2388_v26  ;;  %v1495_v59 = vand.u32 4294901760, %v1494_v56 }
 0x308   : > { %1208 = vmatpush.msrb.mxu0 %v2419_v31  ;;  %1312 = vmatpush.msrb.mxu2 %v2417_v39  ;;  %v1015_v35 = vpop.permute.xlu0 %1014  ;;  %v1256_v43 = vsub.f32 %v2454_v27, %v1255_v25 }
 0x309   : > { %1348 = vmatpush.msrb.mxu3 %v2419_v31  ;;  %v1018_v33 = vsel %vm301_vm15, %v2332_v24, %v1015_v35  ;;  %v1017_v24 = vpop.permute.xlu1 %1016 }
 0x30a   : > { %v2502_v36 = vand.u32 4294901760, %v1018_v33  ;;  %1315 = vmatpush.msrb.mxu2 %v2445_v2  ;;  %v1257_v44 = vand.u32 4294901760, %v1256_v43  ;;  %v1019_v3 = vsel %vm301_vm15, %v1015_v35, %v1017_v24  ;;  %v2538_v43 = vsub.f32 %v1061_v29, %v2508_v9 }
 0x30b   : > { %v2540_v46 = vand.u32 4294901760, %v1019_v3  ;;  %v1505_v24 = vand.u32 4294901760, %v2524_v61 }
 0x30c   : > { %v2515_v38 = vsub.f32 %v1018_v33, %v2502_v36  ;;  %1210 = vmatpush.msrb.mxu0 %v2502_v36  ;;  %1258 = vmatpush.msrb.mxu1 %v1257_v44  ;;  %v1489_v33 = vand.u32 4294901760, %v1488_v57  ;;  %v1511_v40 = vand.u32 4294901760, %v2538_v43 }
 0x30d   : > { %1350 = vmatpush.msrb.mxu3 %v2502_v36  ;;  %v2565_v57 = vsub.f32 %v1019_v3, %v2540_v46  ;;  %v1506_v22 = vsub.f32 %v2524_v61, %v1505_v24 }
 0x30e   : > { %1212 = vmatpush.msrb.mxu0 %v2466_v63  ;;  %1264 = vmatpush.msrb.mxu1 %v1263_v41  ;;  %v1273_v35 = vand.u32 4294901760, %v2515_v38  ;;  %v2556_v41 = vand.u32 4294901760, %v1003_v45  ;;  %v1512_v11 = vsub.f32 %v2538_v43, %v1511_v40 }
 0x30f   : > { %1318 = vmatpush.msrb.mxu2 %v2515_v38  ;;  %1352 = vmatpush.msrb.mxu3 %v2466_v63 }
 0x310   : > { %1218 = vmatmul.f32.vlgmr.msrb.gmra.mxu0 %v2518_v20  ;;  %v1035_v19 = vpop.permute.xlu0 %1034  ;;  %v1274_v44 = vsub.f32 %v2515_v38, %v1273_v35  ;;  %1270 = vmatpush.msrb.mxu1 %v1269_v55  ;;  %v1281_v55 = vand.u32 4294901760, %v1280_v58  ;;  %v1691_v38 = vld.sshfl [vmem:[#allocation1] sm:$0xff pattern:$0x75316420] }
 0x311   : > { %1484 = vmatpush.msra.mxu3 %v1483_v52  ;;  %1370 = vmatpush.msra.mxu0 %v1231_v15  ;;  %v1037_v29 = vsel %vm324_vm10, %v2366_v4, %v1035_v19  ;;  %v1500_v4 = vsub.f32 %v2500_v34, %v1499_v23  ;;  %v1523_v19 = vand.u32 4294901760, %v2565_v57 }
 0x312   : > { %1321 = vmatpush.msrb.mxu2 %v2496_v10  ;;  %v1041_v42 = vsel %vm1934_vm11, %v1037_v29, 0.0  ;;  %v1275_v15 = vand.u32 4294901760, %v1274_v44  ;;  %1356 = vmatmul.f32.vlgmr.msrb.gmra.mxu3 %v2459_v47 }
 0x313   : > { %1490 = vmatpush.msra.mxu3 %v1489_v33  ;;  %v2567_v52 = vand.u32 4294901760, %v1041_v42  ;;  %1374 = vmatpush.msra.mxu0 %v1237_v54  ;;  %v2584_v54 = vsub.f32 %v1003_v45, %v2556_v41  ;;  %v1501_v3 = vand.u32 4294901760, %v1500_v4  ;;  %v1507_v45 = vand.u32 4294901760, %v1506_v22 }
 0x314   : > { %1446 = vmatpush.msra.mxu2 %v2413_v60  ;;  %1276 = vmatpush.msrb.mxu1 %v1275_v15  ;;  %v1513_v33 = vand.u32 4294901760, %v1512_v11  ;;  %v1524_v27 = vsub.f32 %v2565_v57, %v1523_v19 }
 0x315   : > { %1324 = vmatmul.f32.vlgmr.msrb.gmra.mxu2 %v2424_v49  ;;  %1496 = vmatpush.msra.mxu3 %v1495_v59  ;;  %v2575_v56 = vsub.f32 %v1041_v42, %v2567_v52 }
 0x316   : > { %1378 = vmatpush.msra.mxu0 %v1243_v21  ;;  %1448 = vmatpush.msra.mxu2 %v2426_v50  ;;  %v1525_v39 = vand.u32 4294901760, %v1524_v27 }
 0x317   : > { %v1517_v21 = vand.u32 4294901760, %v2575_v56  ;;  %1502 = vmatpush.msra.mxu3 %v1501_v3  ;;  %1282 = vmatpush.msrb.mxu1 %v1281_v55 }
 0x318   : > { %1382 = vmatpush.msra.mxu0 %v1249_v0  ;;  %1450 = vmatpush.msra.mxu2 %v2429_v32  ;;  %v1529_v0 = vand.u32 4294901760, %v2584_v54 }
 0x319   : > { %1284 = vmatmul.f32.vlgmr.msrb.gmra.mxu1 %v2402_v13  ;;  %v1518_v37 = vsub.f32 %v2575_v56, %v1517_v21  ;;  %1508 = vmatpush.msra.mxu3 %v1507_v45 }
 0x31a   : > { %1386 = vmatpush.msra.mxu0 %v1255_v25  ;;  %1416 = vmatpush.msra.mxu1 %v2353_v48  ;;  %v1530_v48 = vsub.f32 %v2584_v54, %v1529_v0 }
 0x31b   : > { %1452 = vmatpush.msra.mxu2 %v2469_v17  ;;  %v1519_v44 = vand.u32 4294901760, %v1518_v37  ;;  %1514 = vmatpush.msra.mxu3 %v1513_v33 }
 0x31c   : > { %1390 = vmatpush.msra.mxu0 %v1261_v16  ;;  %1418 = vmatpush.msra.mxu1 %v2336_v18  ;;  %v1531_v18 = vand.u32 4294901760, %v1530_v48 }
 0x31d   : > { %1454 = vmatpush.msra.mxu2 %v2490_v62  ;;  %1520 = vmatpush.msra.mxu3 %v1519_v44 }
 0x31e   : > { %1394 = vmatpush.msra.mxu0 %v1267_v28  ;;  %1420 = vmatpush.msra.mxu1 %v2342_v6 }
 0x31f   : > { %1456 = vmatpush.msra.mxu2 %v2508_v9  ;;  %1526 = vmatpush.msra.mxu3 %v1525_v39 }
 0x320   : > { %1398 = vmatpush.msra.mxu0 %v1273_v35  ;;  %1422 = vmatpush.msra.mxu1 %v2396_v1 }
 0x321   : > { %1458 = vmatpush.msra.mxu2 %v2567_v52  ;;  %1532 = vmatpush.msra.mxu3 %v1531_v18 }
 0x322   : > { %1402 = vmatpush.msra.mxu0 %v1279_v30  ;;  %1424 = vmatpush.msra.mxu1 %v2439_v51 }
 0x323   : > { %1460 = vmatpush.msra.mxu2 %v2540_v46  ;;  %1404 = vmatmul.f32.vlgmr.msra.gmra.mxu0 %v2402_v13 }
 0x324   : > { %1547 = vmatpush.msrb.mxu0 %v2437_v5  ;;  %1426 = vmatpush.msra.mxu1 %v2388_v26 }
 0x325   : > { %1462 = vmatpush.msra.mxu2 %v2556_v41  ;;  %1666 = vmatpush.msrb.mxu3 %v2413_v60 }
 0x326   : > { %1468 = vmatmul.f32.vlgmr.msra.gmra.mxu2 %v2518_v20  ;;  %1550 = vmatpush.msrb.mxu0 %v2451_v14 }
 0x327   : > { %1620 = vmatpush.msrb.mxu2 %v1481_v8  ;;  %1428 = vmatpush.msra.mxu1 %v2419_v31  ;;  %v1183_v31 = vpop.permute.xlu2 %1182 }
 0x328   : > { %1534 = vmatmul.f32.vlgmr.msra.gmra.mxu3 %v2402_v13  ;;  %1553 = vmatpush.msrb.mxu0 %v2462_v7 }
 0x329   : > { %1624 = vmatpush.msrb.mxu2 %v1487_v53  ;;  %1668 = vmatpush.msrb.mxu3 %v2426_v50 }
 0x32a   : > { %1430 = vmatpush.msra.mxu1 %v2502_v36  ;;  %1556 = vmatpush.msrb.mxu0 %v2500_v34  ;;  %v1692_v34 = vld.sshfl [vmem:[#allocation1 + $0x8] sm:$0xff pattern:$0x75316420] }
 0x32b   : > { %1628 = vmatpush.msrb.mxu2 %v1493_v12  ;;  %1670 = vmatpush.msrb.mxu3 %v2429_v32 }
 0x32c   : > { %1432 = vmatpush.msra.mxu1 %v2466_v63  ;;  %1559 = vmatpush.msrb.mxu0 %v2524_v61 }
 0x32d   : > { %1434 = vmatmul.f32.vlgmr.msra.gmra.mxu1 %v2402_v13  ;;  %1632 = vmatpush.msrb.mxu2 %v1499_v23 }
 0x32e   : > { %1586 = vmatpush.msrb.mxu1 %v2413_v60  ;;  %1672 = vmatpush.msrb.mxu3 %v2469_v17 }
 0x32f   : > { %1562 = vmatpush.msrb.mxu0 %v2538_v43  ;;  %1636 = vmatpush.msrb.mxu2 %v1505_v24 }
 0x330   : > { %1588 = vmatpush.msrb.mxu1 %v2426_v50  ;;  %1674 = vmatpush.msrb.mxu3 %v2490_v62 }
 0x331   : > { %1565 = vmatpush.msrb.mxu0 %v2575_v56  ;;  %1640 = vmatpush.msrb.mxu2 %v1511_v40 }
 0x332   : > { %1590 = vmatpush.msrb.mxu1 %v2429_v32  ;;  %1676 = vmatpush.msrb.mxu3 %v2508_v9 }
 0x333   : > { %1568 = vmatpush.msrb.mxu0 %v2565_v57  ;;  %1644 = vmatpush.msrb.mxu2 %v1517_v21 }
 0x334   : > { %1592 = vmatpush.msrb.mxu1 %v2469_v17  ;;  %1678 = vmatpush.msrb.mxu3 %v2567_v52 }
 0x335   : > { %1571 = vmatpush.msrb.mxu0 %v2584_v54  ;;  %1648 = vmatpush.msrb.mxu2 %v1523_v19 }
 0x336   : > { %1594 = vmatpush.msrb.mxu1 %v2490_v62  ;;  %1680 = vmatpush.msrb.mxu3 %v2540_v46 }
 0x337   : > { %1574 = vmatmul.f32.vlgmr.msrb.gmra.mxu0 %v2424_v49  ;;  %1652 = vmatpush.msrb.mxu2 %v1529_v0 }
 0x338   : > { %1596 = vmatpush.msrb.mxu1 %v2508_v9  ;;  %1682 = vmatpush.msrb.mxu3 %v2556_v41 }
 0x339   : > { %1654 = vmatmul.f32.vlgmr.msrb.gmra.mxu2 %v2402_v13  ;;  %1684 = vmatmul.f32.vlgmr.msrb.gmra.mxu3 %v2402_v13 }
 0x33a   : > { %1598 = vmatpush.msrb.mxu1 %v2567_v52 }
 0x33c   : > { %1600 = vmatpush.msrb.mxu1 %v2540_v46 }
 0x33e   : > { %1602 = vmatpush.msrb.mxu1 %v2556_v41 }
 0x33f   : > { %1606 = vmatmul.f32.vlgmr.msrb.gmra.mxu1 %v2459_v47 }
 0x38d   : > { %v1219_v6 = vpop.f32.mrf.mxu0 }
 0x38e   : > { %v1220_v50 = vadd.f32 %v1219_v6, %v1183_v31 }
 0x395   : > { %v1357_v60 = vpop.f32.mrf.mxu3 }
 0x396   : > { %v1285_v1 = vpop.f32.mrf.mxu1 }
 0x397   : > { %v1286_v5 = vadd.f32 %v1285_v1, %v1220_v50 }
 0x398   : > { %v1325_v26 = vpop.f32.mrf.mxu2 }
 0x399   : > { %v1326_v16 = vadd.f32 %v1325_v26, %v1286_v5 }
 0x39b   : > { %v1358_v63 = vadd.f32 %v1357_v60, %v1326_v16 }
 0x3a0   : > { %v1405_v49 = vpop.f32.mrf.mxu0 }
 0x3a1   : > { %v1406_v25 = vadd.f32 %v1405_v49, %v1358_v63 }
 0x3a9   : > { %v1469_v32 = vpop.f32.mrf.mxu2 }
 0x3aa   : > { %v1435_v51 = vpop.f32.mrf.mxu1  ;;  %v1470_v2 = vadd.f32 %v1469_v32, %v1183_v31 }
 0x3ab   : > { %v1535_v13 = vpop.f32.mrf.mxu3  ;;  %v1436_v62 = vadd.f32 %v1435_v51, %v1406_v25 }
 0x3ac   : > { %v1536_v7 = vadd.f32 %v1535_v13, %v1470_v2 }
 0x3ad   : > { %v1688_v36 = vmax.f32 %v1436_v62, 0.0 }
 0x3af   : > { %v1695_v61 = vadd.f32 %v1691_v38, %v1688_v36 }
 0x3b4   : > { %v1575_v14 = vpop.f32.mrf.mxu0 }
 0x3b5   : > { %v1576_v8 = vadd.f32 %v1575_v14, %v1536_v7 }
 0x3bc   : > { %v1607_v17 = vpop.f32.mrf.mxu1  ;;  %v1655_v47 = vpop.f32.mrf.mxu2 }
 0x3bd   : > { %v1608_v28 = vadd.f32 %v1607_v17, %v1576_v8  ;;  %v1685_v53 = vpop.f32.mrf.mxu3 }
 0x3bf   : > { %v1656_v10 = vadd.f32 %v1655_v47, %v1608_v28 }
 0x3c1   : > { %v1686_v12 = vadd.f32 %v1685_v53, %v1656_v10 }
 0x3c3   : > { %v1689_v9 = vmax.f32 %v1686_v12, 0.0 }
 0x3c5   : > { %v1696_v20 = vadd.f32 %v1692_v34, %v1689_v9 }
 0x3c7   : > { %v1699_v30 = vrot.slane %v1696_v20, 4 }
 0x3c9   : > { %v1701_v35 = vsel %vm1700_vm2, %v1695_v61, %v1699_v30 }
 0x3ca   : > { %1703 = vst [vmem:[%s224_s21] sm:$0x77] %v1701_v35 }
 0x3cb PF: > { %s15_s18 = sadd.s32 1, %s1799_s18  }
 0x3cc   : > { %p12_p4 = scmp.ge.s32.totalorder %s15_s18, 4  }
 0x3ce   :  { %14 = sbr.rel (!%p12_p4) target bundleno = 1 (0x1), region = 70 }

</bundles_post_ra>
